<compile_context>
chip_gen: v5e
topology: v5e:2x2
jax: 0.10.0
libtpu: 0.0.40
codegen_flags: <defaults>
</compile_context>

<pallas_src>
import functools

import numpy as np
import jax
import jax.numpy as jnp
from jax import lax
from jax.experimental import pallas as pl
from jax.experimental.pallas import tpu as pltpu

BN_EPS = 1e-5


def _round_up(x, m):
    return (x + m - 1) // m * m


def _tpu_is_pre_v6():
    try:
        kind = jax.devices()[0].device_kind.lower()
    except Exception:
        return False
    return any(t in kind for t in ("v2", "v3", "v4", "v5"))


_TPU_PRE_V6 = _tpu_is_pre_v6()     # v5e and older: 128-wide MXU, smaller tiles


# ---------------------------------------------------------------------------
# Pallas kernel 1: tiled MXU matmul with fused bias (+residual) (+ReLU)
# (BN scale is folded into the bf16 weights before the call.)
# ---------------------------------------------------------------------------
def _mm_acc_kernel(x_ref, w_ref, b_ref, *rest, relu, residual):
    """grid (i, j, k): K-accumulating variant with an f32 VMEM scratch."""
    if residual:
        r_ref, o_ref, acc_ref = rest
    else:
        o_ref, acc_ref = rest
        r_ref = None
    k = pl.program_id(2)

    @pl.when(k == 0)
    def _():
        acc_ref[...] = jnp.zeros_like(acc_ref)

    acc_ref[...] += jnp.dot(x_ref[...], w_ref[...],
                            preferred_element_type=jnp.float32)

    @pl.when(k == pl.num_programs(2) - 1)
    def _():
        y = acc_ref[...] + b_ref[...]
        if residual:
            y = y + r_ref[...].astype(jnp.float32)
        if relu:
            y = jnp.maximum(y, 0.0)
        o_ref[...] = y.astype(o_ref.dtype)


def _mm_1k_kernel(x_ref, w_ref, b_ref, *rest, relu, residual):
    """grid (i, j): single-K-step fast path (no scratch, direct epilogue)."""
    if residual:
        r_ref, o_ref = rest
    else:
        (o_ref,) = rest
        r_ref = None
    y = jnp.dot(x_ref[...], w_ref[...], preferred_element_type=jnp.float32)
    y = y + b_ref[...]
    if residual:
        y = y + r_ref[...].astype(jnp.float32)
    if relu:
        y = jnp.maximum(y, 0.0)
    o_ref[...] = y.astype(o_ref.dtype)


def _choose_tile(d, cap, unit):
    """Largest tile (multiple of `unit`, <= cap) that avoids padding `d` when
    possible (so jnp.pad / out-slice become no-ops for most encoder layers)."""
    dp = _round_up(d, unit)
    if dp <= cap:
        return dp
    for t in range(cap, unit - 1, -unit):
        if dp % t == 0:
            return t
    return cap


def _matmul_affine(x, w, bias, relu, residual=None, out_dtype=jnp.float32):
    """relu_opt(x @ w + bias [+ residual]).

    x:(M,K) bf16, w:(K,N) bf16 (BN scale pre-folded), bias:(N,) f32,
    residual:(M,N)|None (bf16/f32).  bf16 MXU operands, f32 accumulation.
    """
    M, K = x.shape
    _, N = w.shape

    small_m = M <= 256                      # grid-overhead-bound regime
    cap_m = 1024 if M >= 65536 else (512 if M >= 4096 else 256)
    tm = _choose_tile(M, cap_m, 8)
    tn_pref = 128 if _TPU_PRE_V6 else 256   # 256-wide MXU on v6e/v7x
    tn = tn_pref if N % tn_pref == 0 else 128
    tk_cap = 2048 if small_m else (512 if _TPU_PRE_V6 else 1024)
    tk = _choose_tile(K, tk_cap, 128)

    Mp, Np, Kp = _round_up(M, tm), _round_up(N, tn), _round_up(K, tk)

    xp = x if (Mp == M and Kp == K) else jnp.pad(x, ((0, Mp - M), (0, Kp - K)))
    wp = w if (Kp == K and Np == N) else jnp.pad(w, ((0, Kp - K), (0, Np - N)))
    bp = bias.reshape(1, N).astype(jnp.float32)
    if Np != N:
        bp = jnp.pad(bp, ((0, 0), (0, Np - N)))
    args = [xp, wp, bp]
    has_res = residual is not None
    if has_res:
        rp = residual
        if Mp != M or Np != N:
            rp = jnp.pad(rp, ((0, Mp - M), (0, Np - N)))
        args.append(rp)

    cparams = pltpu.CompilerParams(
        dimension_semantics=(("parallel", "parallel")
                             if Kp == tk else
                             ("parallel", "parallel", "arbitrary")),
        vmem_limit_bytes=32 * 1024 * 1024)

    if Kp == tk:   # single K step: no accumulator scratch, no zero-init pass
        in_specs = [
            pl.BlockSpec((tm, tk), lambda i, j: (i, 0)),
            pl.BlockSpec((tk, tn), lambda i, j: (0, j)),
            pl.BlockSpec((1, tn), lambda i, j: (0, j)),
        ]
        if has_res:
            in_specs.append(pl.BlockSpec((tm, tn), lambda i, j: (i, j)))
        out = pl.pallas_call(
            functools.partial(_mm_1k_kernel, relu=relu, residual=has_res),
            out_shape=jax.ShapeDtypeStruct((Mp, Np), out_dtype),
            grid_spec=pltpu.PrefetchScalarGridSpec(
                num_scalar_prefetch=0,
                grid=(Mp // tm, Np // tn),
                in_specs=in_specs,
                out_specs=pl.BlockSpec((tm, tn), lambda i, j: (i, j)),
            ),
            compiler_params=cparams,
        )(*args)
    else:
        in_specs = [
            pl.BlockSpec((tm, tk), lambda i, j, k: (i, k)),
            pl.BlockSpec((tk, tn), lambda i, j, k: (k, j)),
            pl.BlockSpec((1, tn), lambda i, j, k: (0, j)),
        ]
        if has_res:
            # Same (i, j) block for every k -> fetched once, added in the
            # epilogue: residual add + ReLU fused for free.
            in_specs.append(pl.BlockSpec((tm, tn), lambda i, j, k: (i, j)))
        out = pl.pallas_call(
            functools.partial(_mm_acc_kernel, relu=relu, residual=has_res),
            out_shape=jax.ShapeDtypeStruct((Mp, Np), out_dtype),
            grid_spec=pltpu.PrefetchScalarGridSpec(
                num_scalar_prefetch=0,
                grid=(Mp // tm, Np // tn, Kp // tk),
                in_specs=in_specs,
                out_specs=pl.BlockSpec((tm, tn), lambda i, j, k: (i, j)),
                scratch_shapes=[pltpu.VMEM((tm, tn), jnp.float32)],
            ),
            compiler_params=cparams,
        )(*args)
    if Mp == M and Np == N:
        return out
    return out[:M, :N]


@functools.partial(jax.jit, static_argnames=("stride", "padding", "dilation",
                                              "relu", "out_dtype"))
def conv2d_affine(x, w, scale, bias, residual=None, *, stride=1, padding=0,
                  dilation=1, relu=False, out_dtype=jnp.bfloat16):
    """Conv2d (PyTorch weight layout (Cout,Cin,KH,KW)) on an NHWC input via a
    bf16 (im2col) patch matmul in the fused Pallas MXU kernel.  BN scale is
    folded into the weights; activations are carried in bf16 between layers."""
    N, H, W, Cin = x.shape
    Cout, _, KH, KW = w.shape
    Ho = (H + 2 * padding - dilation * (KH - 1) - 1) // stride + 1
    Wo = (W + 2 * padding - dilation * (KW - 1) - 1) // stride + 1

    wf = (w * scale[:, None, None, None]).astype(jnp.bfloat16)
    wm = jnp.transpose(wf, (2, 3, 1, 0)).reshape(KH * KW * Cin, Cout)

    xb = x.astype(jnp.bfloat16)                       # no-op when carried bf16
    if KH == 1 and KW == 1 and stride == 1 and padding == 0:
        patches = xb.reshape(N * Ho * Wo, Cin)        # 1x1 conv: no im2col
    else:
        xp = jnp.pad(xb, ((0, 0), (padding, padding), (padding, padding), (0, 0)))
        cols = []
        for ki in range(KH):
            for kj in range(KW):
                hs, ws = ki * dilation, kj * dilation
                cols.append(xp[:, hs:hs + stride * (Ho - 1) + 1:stride,
                               ws:ws + stride * (Wo - 1) + 1:stride, :])
        patches = cols[0] if len(cols) == 1 else jnp.concatenate(cols, axis=-1)
        patches = patches.reshape(N * Ho * Wo, KH * KW * Cin)
        # TODO(synk): fold the KHxKW patch gather into the Pallas kernel
        # (in-kernel halo taps) to remove the remaining KH*KW x HBM blowup
        # for the encoder's 3x3/7x7 convs at large tiled-image sizes.
    res2d = residual.reshape(N * Ho * Wo, Cout) if residual is not None else None
    out = _matmul_affine(patches, wm, bias, relu, res2d, out_dtype)
    return out.reshape(N, Ho, Wo, Cout)


# ---------------------------------------------------------------------------
# Pallas kernel 2: decoder 3x3 plane convolution (VPU), strip-restructured.
#
# Layout: (B, C, H, W) planes, zero-padded in HBM to (B, cin, Hp+2, Wi) with
# Wi = round_up(W,128)+128.  grid = (B, n_strips) (all parallel).  Each grid
# step manually DMAs ONE haloed (cin, S+2, Wi) strip into VMEM and produces
# the full (cout, S, Wo) lane-dense output block, so every input plane is read
# once per layer instead of `cout` times.
# ---------------------------------------------------------------------------
def _dec_strip_kernel(w_ref, b_ref, x_hbm, *rest, cin, cout, S, Wo, chunk,
                      relu, input_relu, sigmoid_out):
    if sigmoid_out:
        o_ref, p_ref, xs_ref, sem = rest
    else:
        o_ref, xs_ref, sem = rest
        p_ref = None
    b = pl.program_id(0)
    s = pl.program_id(1)

    # Manual DMA of the haloed input strip (rows s*S .. s*S+S+2 of the padded
    # input).  Compute per strip vastly exceeds the ~few-us DMA, so no
    # double-buffering is needed here.
    cp = pltpu.make_async_copy(
        x_hbm.at[b, :, pl.ds(s * S, S + 2), :], xs_ref, sem)
    cp.start()
    cp.wait()

    if input_relu:
        # Fused F.relu(encoder output): applied once per loaded strip,
        # not once per tap.
        xs_ref[...] = jnp.maximum(xs_ref[...], 0.0)

    n_chunks = S // chunk
    for co in range(cout):
        # The 9*cin folded weights for this output channel: read from SMEM
        # once per grid step (hoisted out of the row loop).
        wts = [w_ref[(co * cin + ci) * 9 + t]
               for ci in range(cin) for t in range(9)]
        bias = b_ref[co]

        def row_body(r, carry, wts=wts, bias=bias, co=co):
            r0 = pl.multiple_of(r * chunk, chunk)
            acc = None
            for ci in range(cin):
                for ki in range(3):
                    for kj in range(3):
                        xs = xs_ref[ci, pl.ds(r0 + ki, chunk), kj:kj + Wo]
                        term = wts[ci * 9 + ki * 3 + kj] * xs
                        acc = term if acc is None else acc + term
            y = acc + bias
            if relu:
                y = jnp.maximum(y, 0.0)
            # Lane-dense (chunk, Wo) store, Wo a multiple of 128 -> unmasked vst.
            o_ref[0, co, pl.ds(r0, chunk), :] = y
            if sigmoid_out:
                p_ref[0, co, pl.ds(r0, chunk), :] = 1.0 / (1.0 + jnp.exp(-y))
            return carry

        lax.fori_loop(0, n_chunks, row_body, 0)


def _pick_strip(H):
    """Row-strip size: multiple of 8, <= 96, minimizing row padding of H."""
    best_s, best_pad = 8, _round_up(H, 8) - H
    for s in range(16, 97, 8):
        pad = _round_up(H, s) - H
        if pad <= best_pad:
            best_s, best_pad = s, pad
    return best_s


@functools.partial(jax.jit,
                   static_argnames=("cin", "cout", "relu", "input_relu",
                                    "sigmoid_out", "valid_h", "valid_w",
                                    "repeat_hw"))
def plane_conv3x3(x, w_eff, b_eff, *, cin, cout, relu, input_relu=False,
                  sigmoid_out=False, valid_h, valid_w, repeat_hw=None):
    """3x3 / pad-1 conv over channel planes.

    x        : (B, >=cin, >=valid_h, >=valid_w) f32 (junk outside valid ignored)
    w_eff    : (cout, cin, 3, 3) f32 with the BN scale already folded in
    b_eff    : (cout,) f32 folded bias
    repeat_hw: optional nearest-upsample factors fused before the conv.
    returns  : (B, cout, Hp, Wo) f32 (valid region [:H, :W])
               [, elementwise sigmoid when sigmoid_out]
    """
    B = x.shape[0]
    x = x[:, :cin, :valid_h, :valid_w].astype(jnp.float32)
    H, W = valid_h, valid_w
    if repeat_hw is not None:                 # dec2 nearest upsample, fused here
        rh, rw = repeat_hw
        x = jnp.repeat(x, rh, axis=2)
        x = jnp.repeat(x, rw, axis=3)
        H, W = H * rh, W * rw

    Wo = _round_up(W, 128)                    # lane-dense output width
    Wi = Wo + 128                             # right conv halo + lane alignment
    S = _pick_strip(H)
    Hp = _round_up(H, S)
    chunk = 8                                 # sublane-aligned row chunk
    n_strips = Hp // S

    # Zero-pad: 1 top row, (Hp-H+1) bottom rows, 1 left col, rest right cols.
    # TODO(synk): fuse this halo re-pad into the producing kernel (ping-pong
    # pre-zeroed buffers + input_output_aliases) to drop one HBM pass/layer.
    xpad = jnp.pad(x, ((0, 0), (0, 0), (1, Hp - H + 1), (1, Wi - W - 1)))
    w_flat = w_eff.reshape(-1).astype(jnp.float32)
    b_vec = b_eff.reshape(-1).astype(jnp.float32)

    out_spec = pl.BlockSpec((1, cout, S, Wo), lambda b, s, *_: (b, 0, s, 0))
    out_shape = jax.ShapeDtypeStruct((B, cout, Hp, Wo), jnp.float32)
    out_shapes = (out_shape, out_shape) if sigmoid_out else out_shape
    out_specs = (out_spec, out_spec) if sigmoid_out else out_spec

    kernel = functools.partial(_dec_strip_kernel, cin=cin, cout=cout, S=S,
                               Wo=Wo, chunk=chunk, relu=relu,
                               input_relu=input_relu, sigmoid_out=sigmoid_out)
    return pl.pallas_call(
        kernel,
        out_shape=out_shapes,
        grid_spec=pltpu.PrefetchScalarGridSpec(
            num_scalar_prefetch=2,            # weight table + bias in SMEM
            grid=(B, n_strips),
            in_specs=[pl.BlockSpec(memory_space=pl.ANY)],   # raw HBM, manual DMA
            out_specs=out_specs,
            scratch_shapes=[pltpu.VMEM((cin, S + 2, Wi), jnp.float32),
                            pltpu.SemaphoreType.DMA],
        ),
        compiler_params=pltpu.CompilerParams(
            dimension_semantics=("parallel", "parallel"),
            vmem_limit_bytes=32 * 1024 * 1024),
    )(w_flat, b_vec, xpad)


# ---------------------------------------------------------------------------
# Parameters (deterministic synthetic init, PyTorch shapes)
# ---------------------------------------------------------------------------
class ParamGen:
    def __init__(self, seed=0):
        self.key = jax.random.PRNGKey(seed)

    def _next(self):
        self.key, sub = jax.random.split(self.key)
        return sub

    def conv(self, cout, cin, kh, kw, bias=False):
        std = float(np.sqrt(2.0 / (cin * kh * kw)))
        w = std * jax.random.normal(self._next(), (cout, cin, kh, kw), jnp.float32)
        b = 0.01 * jax.random.normal(self._next(), (cout,), jnp.float32) if bias else None
        return (w, b)

    def bn(self, c):
        # PyTorch BatchNorm2d defaults (gamma=1, beta=0, running mean/var=0/1).
        return dict(gamma=jnp.ones((c,), jnp.float32),
                    beta=jnp.zeros((c,), jnp.float32),
                    mean=jnp.zeros((c,), jnp.float32),
                    var=jnp.ones((c,), jnp.float32))


def bn_fold(bn, conv_bias=None):
    scale = bn['gamma'] / jnp.sqrt(bn['var'] + BN_EPS)
    bias = bn['beta'] - bn['mean'] * scale
    if conv_bias is not None:
        bias = bias + conv_bias * scale
    return scale, bias


def conv_bn(x, conv_p, bn_p, *, stride=1, padding=0, dilation=1, relu=True,
            residual=None, out_dtype=jnp.bfloat16):
    w, b = conv_p
    scale, bias = bn_fold(bn_p, b)
    return conv2d_affine(x, w, scale, bias, residual, stride=stride,
                         padding=padding, dilation=dilation, relu=relu,
                         out_dtype=out_dtype)


def conv_bias_only(x, conv_p, *, padding=0, relu=False, out_dtype=jnp.float32):
    w, b = conv_p
    cout = w.shape[0]
    scale = jnp.ones((cout,), jnp.float32)
    bias = b if b is not None else jnp.zeros((cout,), jnp.float32)
    return conv2d_affine(x, w, scale, bias, None, stride=1, padding=padding,
                         dilation=1, relu=relu, out_dtype=out_dtype)


# ---------------------------------------------------------------------------
# FCN-ResNet50 encoder (output stride 8, dilated layer3/layer4) + FCN head
# ---------------------------------------------------------------------------
def make_fcn_resnet50_params(pg):
    P = {'conv1': pg.conv(64, 3, 7, 7), 'bn1': pg.bn(64)}
    inplanes = 64
    dilation = 1

    def bottleneck(inp, planes, stride, dil, downsample):
        blk = {'stride': stride, 'dilation': dil}
        blk['conv1'] = pg.conv(planes, inp, 1, 1); blk['bn1'] = pg.bn(planes)
        blk['conv2'] = pg.conv(planes, planes, 3, 3); blk['bn2'] = pg.bn(planes)
        blk['conv3'] = pg.conv(planes * 4, planes, 1, 1); blk['bn3'] = pg.bn(planes * 4)
        if downsample:
            blk['down_conv'] = pg.conv(planes * 4, inp, 1, 1)
            blk['down_bn'] = pg.bn(planes * 4)
        return blk

    def make_layer(planes, blocks, stride, dilate):
        nonlocal inplanes, dilation
        previous_dilation = dilation
        if dilate:
            dilation *= stride
            stride = 1
        downsample = (stride != 1) or (inplanes != planes * 4)
        layer = [bottleneck(inplanes, planes, stride, previous_dilation, downsample)]
        inplanes = planes * 4
        for _ in range(1, blocks):
            layer.append(bottleneck(inplanes, planes, 1, dilation, False))
        return layer

    # fcn_resnet50: replace_stride_with_dilation = [False, True, True]
    P['layer1'] = make_layer(64, 3, 1, False)
    P['layer2'] = make_layer(128, 4, 2, False)
    P['layer3'] = make_layer(256, 6, 2, True)
    P['layer4'] = make_layer(512, 3, 2, True)
    # FCNHead(2048 -> 512 -> num_classes=1)
    P['head_conv1'] = pg.conv(512, 2048, 3, 3)
    P['head_bn'] = pg.bn(512)
    P['head_conv2'] = pg.conv(1, 512, 1, 1, bias=True)
    return P


def bottleneck_forward(x, blk):
    if 'down_conv' in blk:
        identity = conv_bn(x, blk['down_conv'], blk['down_bn'],
                           stride=blk['stride'], relu=False)
    else:
        identity = x
    out = conv_bn(x, blk['conv1'], blk['bn1'], relu=True)
    out = conv_bn(out, blk['conv2'], blk['bn2'], stride=blk['stride'],
                  padding=blk['dilation'], dilation=blk['dilation'], relu=True)
    # conv3 + BN + residual add + ReLU fused into one Pallas matmul epilogue.
    out = conv_bn(out, blk['conv3'], blk['bn3'], relu=True, residual=identity)
    return out


def maxpool_3x3_s2_p1(x):
    # TODO(synk): max-pool kept as lax.reduce_window (single tiny op, not Pallas).
    neg_inf = jnp.array(-jnp.inf, dtype=x.dtype)
    return lax.reduce_window(x, neg_inf, lax.max, (1, 3, 3, 1), (1, 2, 2, 1),
                             ((0, 0), (1, 1), (1, 1), (0, 0)))


def fcn_resnet50_forward(x, P):
    n, h, w, _ = x.shape
    y = conv_bn(x, P['conv1'], P['bn1'], stride=2, padding=3, relu=True)
    y = maxpool_3x3_s2_p1(y)
    for name in ('layer1', 'layer2', 'layer3', 'layer4'):
        for blk in P[name]:
            y = bottleneck_forward(y, blk)
    y = conv_bn(y, P['head_conv1'], P['head_bn'], padding=1, relu=True)
    # Dropout(0.1) -> identity (inference mode)
    y = conv_bias_only(y, P['head_conv2'], out_dtype=jnp.float32)
    # TODO(synk): F.interpolate(..., mode='bilinear', align_corners=False) kept
    # as jax.image.resize (tiny 1-channel map).
    y = jax.image.resize(y, (n, h, w, y.shape[-1]), method='bilinear')
    return y                                          # (B, H, W, 1), pre-ReLU


# ---------------------------------------------------------------------------
# Decoder + full model
# ---------------------------------------------------------------------------
def make_decoder_params(pg):
    D = {}
    D['dec1_conv'] = pg.conv(6, 1, 3, 3, bias=True);   D['dec1_bn'] = pg.bn(6)
    D['dec3_conv'] = pg.conv(12, 6, 3, 3, bias=True);  D['dec3_bn'] = pg.bn(12)
    D['dec4_conv'] = pg.conv(12, 12, 3, 3, bias=True); D['dec4_bn'] = pg.bn(12)
    D['dec5_conv'] = pg.conv(6, 12, 3, 3, bias=True);  D['dec5_bn'] = pg.bn(6)
    D['dec6_conv'] = pg.conv(6, 6, 3, 3, bias=True);   D['dec6_bn'] = pg.bn(6)
    D['dec7_conv'] = pg.conv(1, 6, 3, 3, bias=True)
    return D


def _folded_conv_bn(conv_p, bn_p):
    w, b = conv_p
    scale, bias = bn_fold(bn_p, b)
    return w * scale[:, None, None, None], bias


def decoder_forward(enc_out, D, out_hw=800):
    """enc_out: (B, H0, W0, 1) pre-ReLU encoder output (NHWC)."""
    B, H0, W0, _ = enc_out.shape
    x = jnp.transpose(enc_out, (0, 3, 1, 2))          # (B, 1, H0, W0) planes

    # dec1: Conv(1->6) + BN + ReLU; F.relu(encoder(img)['out']) fused at input.
    w_eff, b_eff = _folded_conv_bn(D['dec1_conv'], D['dec1_bn'])
    x = plane_conv3x3(x, w_eff, b_eff, cin=1, cout=6, relu=True,
                      input_relu=True, valid_h=H0, valid_w=W0)

    # dec2: nn.Upsample(size=(800,800), mode='nearest').  For integer ratios
    # it is a broadcast-repeat fused into dec3's program (no gather).
    if out_hw % H0 == 0 and out_hw % W0 == 0:
        rep = (out_hw // H0, out_hw // W0)
        vh, vw = H0, W0
    else:
        rep = None
        hi = (jnp.arange(out_hw) * H0) // out_hw
        wi = (jnp.arange(out_hw) * W0) // out_hw
        x = x[:, :, :H0, :W0][:, :, hi[:, None], wi[None, :]]
        vh, vw = out_hw, out_hw
        # TODO(synk): fold the non-integer-ratio nearest gather into dec3.

    for i, (name, cin, cout) in enumerate((('dec3', 6, 12), ('dec4', 12, 12),
                                           ('dec5', 12, 6), ('dec6', 6, 6))):
        w_eff, b_eff = _folded_conv_bn(D[name + '_conv'], D[name + '_bn'])
        x = plane_conv3x3(x, w_eff, b_eff, cin=cin, cout=cout, relu=True,
                          valid_h=vh, valid_w=vw,
                          repeat_hw=rep if i == 0 else None)
        vh, vw = out_hw, out_hw

    # dec7: Conv(6->1) with bias; squeeze + sigmoid fused in-kernel.
    w7, b7 = D['dec7_conv']
    logits, probs = plane_conv3x3(x, w7, b7, cin=6, cout=1, relu=False,
                                  sigmoid_out=True, valid_h=vh, valid_w=vw)
    return (logits[:, 0, :out_hw, :out_hw], probs[:, 0, :out_hw, :out_hw])


def road_segmentation_forward(img, params):
    """img: (B, 3, H, W) float32 (PyTorch NCHW tiled image)."""
    x = jnp.transpose(img, (0, 2, 3, 1))              # -> NHWC
    enc = fcn_resnet50_forward(x, params['encoder'])  # (B, H, W, 1)
    return decoder_forward(enc, params['decoder'])


# ---------------------------------------------------------------------------
if __name__ == "__main__":
    key = jax.random.PRNGKey(0)
    B, C, H, W = 1, 3, 32, 32                         # small tiled-image input
    img = jax.random.normal(key, (B, C, H, W), jnp.float32)

    pg = ParamGen(seed=0)
    params = {'encoder': make_fcn_resnet50_params(pg),
              'decoder': make_decoder_params(pg)}

    logits, probs = road_segmentation_forward(img, params)
    jax.block_until_ready((logits, probs))

    assert logits.shape == (B, 800, 800) and probs.shape == (B, 800, 800)
    assert bool(jnp.all(jnp.isfinite(logits))) and bool(jnp.all(jnp.isfinite(probs)))
    assert bool(jnp.all((probs >= 0.0) & (probs <= 1.0)))
    print("KERNEL_OK")
</pallas_src>

<mosaic_0001>
module attributes {stable_mosaic.version = 11 : i64} {
  func.func @_mm_1k_kernel(%arg0: i32, %arg1: i32, %arg2: memref<256x256xbf16, #tpu.memory_space<vmem>>, %arg3: memref<256x128xbf16, #tpu.memory_space<vmem>>, %arg4: memref<1x128xf32, #tpu.memory_space<vmem>>, %arg5: memref<256x128xbf16, #tpu.memory_space<vmem>>) attributes {dimension_semantics = [#tpu.dimension_semantics<parallel>, #tpu.dimension_semantics<parallel>], iteration_bounds = array<i64: 1, 1>, scalar_prefetch = 0 : i64, scratch_operands = 0 : i64, tpu.core_type = #tpu.core_type<tc>, window_params = [{transform_indices = @transform_0, window_bounds = array<i64: 256, 256>}, {transform_indices = @transform_1, window_bounds = array<i64: 256, 128>}, {transform_indices = @transform_2, window_bounds = array<i64: 1, 128>}, {transform_indices = @transform_3, window_bounds = array<i64: 256, 128>}]} {
    %c0 = arith.constant 0 : index
    %c0_0 = arith.constant 0 : index
    %0 = vector.load %arg2[%c0, %c0_0] : memref<256x256xbf16, #tpu.memory_space<vmem>>, vector<256x256xbf16>
    %c0_1 = arith.constant 0 : index
    %c0_2 = arith.constant 0 : index
    %1 = vector.load %arg3[%c0_1, %c0_2] : memref<256x128xbf16, #tpu.memory_space<vmem>>, vector<256x128xbf16>
    %cst = arith.constant dense<0.000000e+00> : vector<256x128xf32>
    %2 = tpu.matmul %0, %1, %cst {dimension_numbers = #tpu.dot_dimension_numbers<[1], [0], [0], [1], [0, 0, 1, 1], [], []>} : vector<256x256xbf16>, vector<256x128xbf16>, vector<256x128xf32> -> vector<256x128xf32>
    %c0_3 = arith.constant 0 : index
    %c0_4 = arith.constant 0 : index
    %3 = vector.load %arg4[%c0_3, %c0_4] : memref<1x128xf32, #tpu.memory_space<vmem>>, vector<1x128xf32>
    %4 = vector.broadcast %3 : vector<1x128xf32> to vector<256x128xf32>
    %5 = arith.addf %2, %4 : vector<256x128xf32>
    %cst_5 = arith.constant 0.000000e+00 : f32
    %6 = vector.broadcast %cst_5 : f32 to vector<256x128xf32>
    %7 = arith.maximumf %5, %6 : vector<256x128xf32>
    %8 = arith.truncf %7 : vector<256x128xf32> to vector<256x128xbf16>
    %c0_6 = arith.constant 0 : index
    %c0_7 = arith.constant 0 : index
    %9 = vector.load %arg5[%c0_6, %c0_7] : memref<256x128xbf16, #tpu.memory_space<vmem>>, vector<256x128xbf16>
    tpu.vector_store %arg5[%c0_6, %c0_7], %8 {strides = array<i32>} : memref<256x128xbf16, #tpu.memory_space<vmem>>, vector<256x128xbf16>,
    return
  }
  func.func @transform_0(%arg0: i32, %arg1: i32) -> (i32, i32) {
    %c0_i32 = arith.constant 0 : i32
    %c0_i32_0 = arith.constant 0 : i32
    return %arg0, %c0_i32 : i32, i32
  }
  func.func @transform_1(%arg0: i32, %arg1: i32) -> (i32, i32) {
    %c0_i32 = arith.constant 0 : i32
    %c0_i32_0 = arith.constant 0 : i32
    return %c0_i32, %arg1 : i32, i32
  }
  func.func @transform_2(%arg0: i32, %arg1: i32) -> (i32, i32) {
    %c0_i32 = arith.constant 0 : i32
    %c0_i32_0 = arith.constant 0 : i32
    return %c0_i32, %arg1 : i32, i32
  }
  func.func @transform_3(%arg0: i32, %arg1: i32) -> (i32, i32) {
    %c0_i32 = arith.constant 0 : i32
    return %arg0, %arg1 : i32, i32
  }
}

</mosaic_0001>

<bundles_post_ra>
// kernel: conv2d_affine.1
= control target key start
LH: loop header
LB: loop body
LE: loop exit
PB: predicated region body
PF: predicated region fallthrough
CT: control target
= control target key end

     0   :  { %s1315_s0 = inlined_call_operand.vmem [shape: bf16[256,256], index: 0, kind: input, shape index: {}]   ;;  %s1316_s1 = inlined_call_operand.vmem [shape: bf16[256,128], index: 1, kind: input, shape index: {}]   ;;  %s1317_s2 = inlined_call_operand.vmem [shape: f32[1,128], index: 2, kind: input, shape index: {}]   ;;  %s1318_s3 = inlined_call_operand.hbm [shape: bf16[256,128], index: 3, kind: output, shape index: {}]  }
   0x1   :  { %v862_v0 = vld [vmem:[%s1316_s1 + $0x38] sm:$0xff]  ;;  %v861_v2 = vld [vmem:[%s1316_s1 + $0x30] sm:$0xff]  ;;  %v860_v4 = vld [vmem:[%s1316_s1 + $0x28] sm:$0xff] }
   0x2   :  { %v870_v1 = vld [vmem:[%s1316_s1 + $0x78] sm:$0xff]  ;;  %339 = vmatpush.bf16.msra.mxu0 %v862_v0  ;;  %966 = vmatpush.bf16.msra.mxu2 %v862_v0  ;;  %v869_v3 = vld [vmem:[%s1316_s1 + $0x70] sm:$0xff]  ;;  %v868_v5 = vld [vmem:[%s1316_s1 + $0x68] sm:$0xff] }
   0x3   :  { %428 = vmatpush.bf16.msra.mxu1 %v870_v1  ;;  %974 = vmatpush.bf16.msra.mxu3 %v870_v1 }
   0x6   :  { %340 = vmatpush.bf16.msra.mxu0 %v861_v2  ;;  %967 = vmatpush.bf16.msra.mxu2 %v861_v2 }
   0x7   :  { %429 = vmatpush.bf16.msra.mxu1 %v869_v3  ;;  %975 = vmatpush.bf16.msra.mxu3 %v869_v3 }
   0x8   :  { %8 = vsyncpa [#allocation3], 0  ;;  %v859_v6 = vld [vmem:[%s1316_s1 + $0x20] sm:$0xff]  ;;  %v858_v8 = vld [vmem:[%s1316_s1 + $0x18] sm:$0xff]  ;;  %s619_s9 = sshll.u32 %s1318_s3, 4  ;;  %s1013_s10 = smov 64   ;;  %s620_s9 = int_to_ptr.hbm [resolvable:$true] %s619_s9 }
   0x9   :  { %v867_v7 = vld [vmem:[%s1316_s1 + $0x60] sm:$0xff]  ;;  %v866_v9 = vld [vmem:[%s1316_s1 + $0x58] sm:$0xff]  ;;  %v857_v10 = vld [vmem:[%s1316_s1 + $0x10] sm:$0xff]  ;;  %s1014_s11 = smov 4  }
   0xa   :  { %341 = vmatpush.bf16.msra.mxu0 %v860_v4  ;;  %968 = vmatpush.bf16.msra.mxu2 %v860_v4  ;;  %v865_v11 = vld [vmem:[%s1316_s1 + $0x50] sm:$0xff]  ;;  %v856_v12 = vld [vmem:[%s1316_s1 + $0x8] sm:$0xff]  ;;  %v855_v14 = vld [vmem:[%s1316_s1] sm:$0xff] }
   0xb   :  { %430 = vmatpush.bf16.msra.mxu1 %v868_v5  ;;  %976 = vmatpush.bf16.msra.mxu3 %v868_v5  ;;  %v864_v13 = vld [vmem:[%s1316_s1 + $0x48] sm:$0xff]  ;;  %v863_v15 = vld [vmem:[%s1316_s1 + $0x40] sm:$0xff]  ;;  %v641_v28 = vld [vmem:[%s1315_s0 + $0x10] sm:$0xf] }
   0xc   :  { %v633_v16 = vld [vmem:[%s1315_s0] sm:$0xf]  ;;  %v824_v17 = vld [vmem:[%s1315_s0 + $0x4] sm:$0xf0]  ;;  %v823_v20 = vld [vmem:[%s1315_s0 + $0x4] sm:$0xf] }
   0xd   :  { %v697_v18 = vld [vmem:[%s1315_s0 + $0x80] sm:$0xf]  ;;  %v840_v19 = vld [vmem:[%s1315_s0 + $0x84] sm:$0xf0]  ;;  %v635_v21 = vld [vmem:[%s1315_s0 + $0x8] sm:$0xf0]  ;;  %v634_v24 = vor.u32 %v824_v17, %v633_v16 }
   0xe   :  { %342 = vmatpush.bf16.msra.mxu0 %v859_v6  ;;  %969 = vmatpush.bf16.msra.mxu2 %v859_v6  ;;  %v839_v22 = vld [vmem:[%s1315_s0 + $0x84] sm:$0xf]  ;;  %v699_v23 = vld [vmem:[%s1315_s0 + $0x88] sm:$0xf0]  ;;  %v698_v25 = vor.u32 %v840_v19, %v697_v18  ;;  %v638_v26 = vor.u32 %v823_v20, %v635_v21  ;;  %v826_v29 = vld [vmem:[%s1315_s0 + $0x14] sm:$0xf0] }
   0xf   :  { %431 = vmatpush.bf16.msra.mxu1 %v867_v7  ;;  %977 = vmatpush.bf16.msra.mxu3 %v867_v7  ;;  %v702_v27 = vor.u32 %v839_v22, %v699_v23  ;;  %v705_v30 = vld [vmem:[%s1315_s0 + $0x90] sm:$0xf]  ;;  %v842_v31 = vld [vmem:[%s1315_s0 + $0x94] sm:$0xf0]  ;;  %v825_v32 = vld [vmem:[%s1315_s0 + $0x14] sm:$0xf]  ;;  %v642_v36 = vor.u32 %v826_v29, %v641_v28 }
  0x10   :  { %v643_v33 = vld [vmem:[%s1315_s0 + $0x18] sm:$0xf0]  ;;  %v841_v34 = vld [vmem:[%s1315_s0 + $0x94] sm:$0xf]  ;;  %v706_v37 = vor.u32 %v842_v31, %v705_v30  ;;  %v649_v40 = vld [vmem:[%s1315_s0 + $0x20] sm:$0xf] }
  0x11   :  { %v707_v35 = vld [vmem:[%s1315_s0 + $0x98] sm:$0xf0]  ;;  %v646_v38 = vor.u32 %v825_v32, %v643_v33  ;;  %v828_v41 = vld [vmem:[%s1315_s0 + $0x24] sm:$0xf0]  ;;  %v713_v42 = vld [vmem:[%s1315_s0 + $0xa0] sm:$0xf] }
  0x12   :  { %343 = vmatpush.bf16.msra.mxu0 %v858_v8  ;;  %970 = vmatpush.bf16.msra.mxu2 %v858_v8  ;;  %v710_v39 = vor.u32 %v841_v34, %v707_v35  ;;  %v844_v43 = vld [vmem:[%s1315_s0 + $0xa4] sm:$0xf0]  ;;  %v827_v44 = vld [vmem:[%s1315_s0 + $0x24] sm:$0xf]  ;;  %v651_v45 = vld [vmem:[%s1315_s0 + $0x28] sm:$0xf0]  ;;  %v650_v48 = vor.u32 %v828_v41, %v649_v40 }
  0x13   :  { %432 = vmatpush.bf16.msra.mxu1 %v866_v9  ;;  %978 = vmatpush.bf16.msra.mxu3 %v866_v9  ;;  %v843_v46 = vld [vmem:[%s1315_s0 + $0xa4] sm:$0xf]  ;;  %v715_v47 = vld [vmem:[%s1315_s0 + $0xa8] sm:$0xf0]  ;;  %v714_v49 = vor.u32 %v844_v43, %v713_v42  ;;  %v654_v50 = vor.u32 %v827_v44, %v651_v45  ;;  %v657_v52 = vld [vmem:[%s1315_s0 + $0x30] sm:$0xf] }
  0x14   :  { %v718_v51 = vor.u32 %v843_v46, %v715_v47  ;;  %v830_v53 = vld [vmem:[%s1315_s0 + $0x34] sm:$0xf0]  ;;  %v721_v54 = vld [vmem:[%s1315_s0 + $0xb0] sm:$0xf]  ;;  %v829_v56 = vld [vmem:[%s1315_s0 + $0x34] sm:$0xf] }
  0x15   :  { %v846_v55 = vld [vmem:[%s1315_s0 + $0xb4] sm:$0xf0]  ;;  %v659_v57 = vld [vmem:[%s1315_s0 + $0x38] sm:$0xf0]  ;;  %v845_v58 = vld [vmem:[%s1315_s0 + $0xb4] sm:$0xf]  ;;  %v658_v60 = vor.u32 %v830_v53, %v657_v52 }
  0x16   :  { %344 = vmatpush.bf16.msra.mxu0 %v857_v10  ;;  %971 = vmatpush.bf16.msra.mxu2 %v857_v10  ;;  %v723_v59 = vld [vmem:[%s1315_s0 + $0xb8] sm:$0xf0]  ;;  %v722_v61 = vor.u32 %v846_v55, %v721_v54  ;;  %v662_v62 = vor.u32 %v829_v56, %v659_v57  ;;  %v665_v0 = vld [vmem:[%s1315_s0 + $0x40] sm:$0xf]  ;;  %v832_v1 = vld [vmem:[%s1315_s0 + $0x44] sm:$0xf0] }
  0x17   :  { %433 = vmatpush.bf16.msra.mxu1 %v865_v11  ;;  %979 = vmatpush.bf16.msra.mxu3 %v865_v11  ;;  %v726_v63 = vor.u32 %v845_v58, %v723_v59  ;;  %v729_v2 = vld [vmem:[%s1315_s0 + $0xc0] sm:$0xf]  ;;  %v848_v3 = vld [vmem:[%s1315_s0 + $0xc4] sm:$0xf0]  ;;  %v831_v4 = vld [vmem:[%s1315_s0 + $0x44] sm:$0xf]  ;;  %v666_v8 = vor.u32 %v832_v1, %v665_v0 }
  0x18   :  { %v667_v5 = vld [vmem:[%s1315_s0 + $0x48] sm:$0xf0]  ;;  %v847_v6 = vld [vmem:[%s1315_s0 + $0xc4] sm:$0xf]  ;;  %v730_v9 = vor.u32 %v848_v3, %v729_v2  ;;  %v833_v16 = vld [vmem:[%s1315_s0 + $0x54] sm:$0xf] }
  0x19   :  { %v731_v7 = vld [vmem:[%s1315_s0 + $0xc8] sm:$0xf0]  ;;  %v670_v10 = vor.u32 %v831_v4, %v667_v5  ;;  %v675_v17 = vld [vmem:[%s1315_s0 + $0x58] sm:$0xf0]  ;;  %v849_v18 = vld [vmem:[%s1315_s0 + $0xd4] sm:$0xf] }
  0x1a   :  { %345 = vmatpush.bf16.msra.mxu0 %v856_v12  ;;  %972 = vmatpush.bf16.msra.mxu2 %v856_v12  ;;  %v734_v11 = vor.u32 %v847_v6, %v731_v7  ;;  %v673_v12 = vld [vmem:[%s1315_s0 + $0x50] sm:$0xf]  ;;  %v739_v19 = vld [vmem:[%s1315_s0 + $0xd8] sm:$0xf0]  ;;  %v678_v22 = vor.u32 %v833_v16, %v675_v17  ;;  %v835_v28 = vld [vmem:[%s1315_s0 + $0x64] sm:$0xf] }
  0x1b   :  { %434 = vmatpush.bf16.msra.mxu1 %v864_v13  ;;  %980 = vmatpush.bf16.msra.mxu3 %v864_v13  ;;  %v834_v13 = vld [vmem:[%s1315_s0 + $0x54] sm:$0xf0]  ;;  %v742_v23 = vor.u32 %v849_v18, %v739_v19  ;;  %v683_v29 = vld [vmem:[%s1315_s0 + $0x68] sm:$0xf0]  ;;  %v851_v30 = vld [vmem:[%s1315_s0 + $0xe4] sm:$0xf] }
  0x1c   :  { %v674_v20 = vor.u32 %v834_v13, %v673_v12  ;;  %v747_v31 = vld [vmem:[%s1315_s0 + $0xe8] sm:$0xf0]  ;;  %v686_v34 = vor.u32 %v835_v28, %v683_v29  ;;  %v837_v40 = vld [vmem:[%s1315_s0 + $0x74] sm:$0xf]  ;;  %v691_v41 = vld [vmem:[%s1315_s0 + $0x78] sm:$0xf0] }
  0x1d   :  { %v750_v35 = vor.u32 %v851_v30, %v747_v31  ;;  %v853_v42 = vld [vmem:[%s1315_s0 + $0xf4] sm:$0xf]  ;;  %v755_v43 = vld [vmem:[%s1315_s0 + $0xf8] sm:$0xf0]  ;;  %v694_v46 = vor.u32 %v837_v40, %v691_v41 }
  0x1e   :  { %346 = vmatpush.bf16.msra.mxu0 %v855_v14  ;;  %973 = vmatpush.bf16.msra.mxu2 %v855_v14  ;;  %v737_v14 = vld [vmem:[%s1315_s0 + $0xd0] sm:$0xf]  ;;  %v758_v47 = vor.u32 %v853_v42, %v755_v43 }
  0x1f   :  { %435 = vmatpush.bf16.msra.mxu1 %v863_v15  ;;  %981 = vmatpush.bf16.msra.mxu3 %v863_v15  ;;  %v850_v15 = vld [vmem:[%s1315_s0 + $0xd4] sm:$0xf0] }
  0x20   :  { %v738_v21 = vor.u32 %v850_v15, %v737_v14 }
  0x21   :  { %347 = vmatmul.bf16.vlgmr.msra.gmra.mxu0 %v634_v24  ;;  %387 = vmatmul.bf16.vlgmr.msra.gmra.mxu2 %v698_v25  ;;  %v681_v24 = vld [vmem:[%s1315_s0 + $0x60] sm:$0xf]  ;;  %v836_v25 = vld [vmem:[%s1315_s0 + $0x64] sm:$0xf0] }
  0x22   :  { %436 = vmatmul.bf16.vlgmr.msra.gmra.mxu1 %v638_v26  ;;  %476 = vmatmul.bf16.vlgmr.msra.gmra.mxu3 %v702_v27  ;;  %v745_v26 = vld [vmem:[%s1315_s0 + $0xe0] sm:$0xf]  ;;  %v852_v27 = vld [vmem:[%s1315_s0 + $0xe4] sm:$0xf0]  ;;  %v682_v32 = vor.u32 %v836_v25, %v681_v24 }
  0x23   :  { %v746_v33 = vor.u32 %v852_v27, %v745_v26 }
  0x31   :  { %352 = vmatmul.bf16.gmra.mxu0 %v642_v36  ;;  %392 = vmatmul.bf16.gmra.mxu2 %v706_v37  ;;  %v689_v36 = vld [vmem:[%s1315_s0 + $0x70] sm:$0xf]  ;;  %v838_v37 = vld [vmem:[%s1315_s0 + $0x74] sm:$0xf0] }
  0x32   :  { %441 = vmatmul.bf16.gmra.mxu1 %v646_v38  ;;  %481 = vmatmul.bf16.gmra.mxu3 %v710_v39  ;;  %v753_v38 = vld [vmem:[%s1315_s0 + $0xf0] sm:$0xf]  ;;  %v854_v39 = vld [vmem:[%s1315_s0 + $0xf4] sm:$0xf0]  ;;  %v690_v44 = vor.u32 %v838_v37, %v689_v36  ;;  %s1012_s0 = smov [#allocation2]  }
  0x33   :  { %v754_v45 = vor.u32 %v854_v39, %v753_v38 }
  0x41   :  { %357 = vmatmul.bf16.gmra.mxu0 %v650_v48  ;;  %397 = vmatmul.bf16.gmra.mxu2 %v714_v49  ;;  %v1278_v49 = vld [vmem:[%s1317_s2] ss:$0 sm:$0xff]  ;;  %s617_s2 = sshll.u32 %s1012_s0, 4  ;;  %s618_s2 = int_to_ptr.vmem [resolvable:$true] %s617_s2 }
  0x42   :  { %446 = vmatmul.bf16.gmra.mxu1 %v654_v50  ;;  %486 = vmatmul.bf16.gmra.mxu3 %v718_v51 }
  0x51   :  { %362 = vmatmul.bf16.gmra.mxu0 %v658_v60  ;;  %402 = vmatmul.bf16.gmra.mxu2 %v722_v61 }
  0x52   :  { %451 = vmatmul.bf16.gmra.mxu1 %v662_v62  ;;  %491 = vmatmul.bf16.gmra.mxu3 %v726_v63 }
  0x61   :  { %367 = vmatmul.bf16.gmra.mxu0 %v666_v8  ;;  %407 = vmatmul.bf16.gmra.mxu2 %v730_v9 }
  0x62   :  { %456 = vmatmul.bf16.gmra.mxu1 %v670_v10  ;;  %496 = vmatmul.bf16.gmra.mxu3 %v734_v11 }
  0x71   :  { %372 = vmatmul.bf16.gmra.mxu0 %v674_v20  ;;  %412 = vmatmul.bf16.gmra.mxu2 %v738_v21 }
  0x72   :  { %461 = vmatmul.bf16.gmra.mxu1 %v678_v22  ;;  %501 = vmatmul.bf16.gmra.mxu3 %v742_v23 }
  0x81   :  { %377 = vmatmul.bf16.gmra.mxu0 %v682_v32  ;;  %417 = vmatmul.bf16.gmra.mxu2 %v746_v33 }
  0x82   :  { %466 = vmatmul.bf16.gmra.mxu1 %v686_v34  ;;  %506 = vmatmul.bf16.gmra.mxu3 %v750_v35 }
  0x91   :  { %382 = vmatmul.bf16.gmra.mxu0 %v690_v44  ;;  %422 = vmatmul.bf16.gmra.mxu2 %v754_v45 }
  0x92   :  { %471 = vmatmul.bf16.gmra.mxu1 %v694_v46  ;;  %511 = vmatmul.bf16.gmra.mxu3 %v758_v47 }
  0x9e   :  { %v348_v48 = vpop.f32.mrf.mxu0 }
  0x9f   :  { %v437_v50 = vpop.f32.mrf.mxu1  ;;  %v349_v51 = vadd.f32 %v1278_v49, %v348_v48 }
  0xa1   :  { %v438_v55 = vadd.f32 %v437_v50, %v349_v51 }
  0xa3   :  { %v517_v60 = vmax.f32 %v438_v55, 0.0 }
  0xa4   :  { %v388_v52 = vpop.f32.mrf.mxu2 }
  0xa5   :  { %v477_v53 = vpop.f32.mrf.mxu3  ;;  %v389_v58 = vadd.f32 %v1278_v49, %v388_v52 }
  0xa6   :  { %v350_v54 = vpop.f32.mrf.mxu0 }
  0xa7   :  { %v351_v56 = vadd.f32 %v1278_v49, %v350_v54  ;;  %v439_v57 = vpop.f32.mrf.mxu1  ;;  %v478_v63 = vadd.f32 %v477_v53, %v389_v58 }
  0xa9   :  { %v440_v59 = vadd.f32 %v439_v57, %v351_v56  ;;  %v533_v6 = vmax.f32 %v478_v63, 0.0 }
  0xab   :  { %v518_v61 = vmax.f32 %v440_v59, 0.0 }
  0xac   :  { %v390_v62 = vpop.f32.mrf.mxu2 }
  0xad   :  { %v874_v0 = vpack.c.bf16 %v518_v61, %v517_v60  ;;  %v391_v1 = vadd.f32 %v1278_v49, %v390_v62  ;;  %v479_v2 = vpop.f32.mrf.mxu3 }
  0xae   :  { %v353_v3 = vpop.f32.mrf.mxu0 }
  0xaf   :  { %875 = vst [vmem:[#allocation2] sm:$0xff] %v874_v0   ;;  %v480_v4 = vadd.f32 %v479_v2, %v391_v1  ;;  %v442_v5 = vpop.f32.mrf.mxu1  ;;  %v354_v9 = vadd.f32 %v1278_v49, %v353_v3 }
  0xb1   :  { %v534_v7 = vmax.f32 %v480_v4, 0.0  ;;  %v443_v13 = vadd.f32 %v442_v5, %v354_v9 }
  0xb3   :  { %v914_v8 = vpack.c.bf16 %v534_v7, %v533_v6  ;;  %v519_v18 = vmax.f32 %v443_v13, 0.0 }
  0xb4   :  { %v393_v10 = vpop.f32.mrf.mxu2 }
  0xb5   :  { %958 = vst [vmem:[#allocation2 + $0x40] sm:$0xff] %v914_v8   ;;  %v482_v11 = vpop.f32.mrf.mxu3  ;;  %v394_v16 = vadd.f32 %v1278_v49, %v393_v10 }
  0xb6   :  { %v355_v12 = vpop.f32.mrf.mxu0 }
  0xb7   :  { %v356_v14 = vadd.f32 %v1278_v49, %v355_v12  ;;  %v444_v15 = vpop.f32.mrf.mxu1  ;;  %v483_v21 = vadd.f32 %v482_v11, %v394_v16 }
  0xb9   :  { %v445_v17 = vadd.f32 %v444_v15, %v356_v14  ;;  %v535_v28 = vmax.f32 %v483_v21, 0.0 }
  0xbb   :  { %v520_v19 = vmax.f32 %v445_v17, 0.0 }
  0xbc   :  { %v395_v20 = vpop.f32.mrf.mxu2 }
  0xbd   :  { %v879_v22 = vpack.c.bf16 %v520_v19, %v519_v18  ;;  %v396_v23 = vadd.f32 %v1278_v49, %v395_v20  ;;  %v484_v24 = vpop.f32.mrf.mxu3 }
  0xbe   :  { %v358_v25 = vpop.f32.mrf.mxu0 }
  0xbf   :  { %951 = vst [vmem:[#allocation2 + $0x8] sm:$0xff] %v879_v22   ;;  %v485_v26 = vadd.f32 %v484_v24, %v396_v23  ;;  %v447_v27 = vpop.f32.mrf.mxu1  ;;  %v359_v31 = vadd.f32 %v1278_v49, %v358_v25 }
  0xc1   :  { %v536_v29 = vmax.f32 %v485_v26, 0.0  ;;  %v448_v35 = vadd.f32 %v447_v27, %v359_v31 }
  0xc3   :  { %v919_v30 = vpack.c.bf16 %v536_v29, %v535_v28  ;;  %v521_v40 = vmax.f32 %v448_v35, 0.0 }
  0xc4   :  { %v398_v32 = vpop.f32.mrf.mxu2 }
  0xc5   :  { %959 = vst [vmem:[#allocation2 + $0x48] sm:$0xff] %v919_v30   ;;  %v487_v33 = vpop.f32.mrf.mxu3  ;;  %v399_v38 = vadd.f32 %v1278_v49, %v398_v32 }
  0xc6   :  { %v360_v34 = vpop.f32.mrf.mxu0 }
  0xc7   :  { %v361_v36 = vadd.f32 %v1278_v49, %v360_v34  ;;  %v449_v37 = vpop.f32.mrf.mxu1  ;;  %v488_v43 = vadd.f32 %v487_v33, %v399_v38 }
  0xc9   :  { %v450_v39 = vadd.f32 %v449_v37, %v361_v36  ;;  %v537_v51 = vmax.f32 %v488_v43, 0.0 }
  0xcb   :  { %v522_v41 = vmax.f32 %v450_v39, 0.0 }
  0xcc   :  { %v400_v42 = vpop.f32.mrf.mxu2 }
  0xcd   :  { %v884_v44 = vpack.c.bf16 %v522_v41, %v521_v40  ;;  %v401_v45 = vadd.f32 %v1278_v49, %v400_v42  ;;  %v489_v46 = vpop.f32.mrf.mxu3 }
  0xce   :  { %v363_v47 = vpop.f32.mrf.mxu0 }
  0xcf   :  { %952 = vst [vmem:[#allocation2 + $0x10] sm:$0xff] %v884_v44   ;;  %v490_v48 = vadd.f32 %v489_v46, %v401_v45  ;;  %v452_v50 = vpop.f32.mrf.mxu1  ;;  %v364_v54 = vadd.f32 %v1278_v49, %v363_v47 }
  0xd1   :  { %v538_v52 = vmax.f32 %v490_v48, 0.0  ;;  %v453_v58 = vadd.f32 %v452_v50, %v364_v54 }
  0xd3   :  { %v924_v53 = vpack.c.bf16 %v538_v52, %v537_v51  ;;  %v523_v63 = vmax.f32 %v453_v58, 0.0 }
  0xd4   :  { %v403_v55 = vpop.f32.mrf.mxu2 }
  0xd5   :  { %960 = vst [vmem:[#allocation2 + $0x50] sm:$0xff] %v924_v53   ;;  %v492_v56 = vpop.f32.mrf.mxu3  ;;  %v404_v61 = vadd.f32 %v1278_v49, %v403_v55 }
  0xd6   :  { %v365_v57 = vpop.f32.mrf.mxu0 }
  0xd7   :  { %v366_v59 = vadd.f32 %v1278_v49, %v365_v57  ;;  %v454_v60 = vpop.f32.mrf.mxu1  ;;  %v493_v2 = vadd.f32 %v492_v56, %v404_v61 }
  0xd9   :  { %v455_v62 = vadd.f32 %v454_v60, %v366_v59  ;;  %v539_v9 = vmax.f32 %v493_v2, 0.0 }
  0xdb   :  { %v524_v0 = vmax.f32 %v455_v62, 0.0 }
  0xdc   :  { %v405_v1 = vpop.f32.mrf.mxu2 }
  0xdd   :  { %v889_v3 = vpack.c.bf16 %v524_v0, %v523_v63  ;;  %v406_v4 = vadd.f32 %v1278_v49, %v405_v1  ;;  %v494_v5 = vpop.f32.mrf.mxu3 }
  0xde   :  { %v368_v6 = vpop.f32.mrf.mxu0 }
  0xdf   :  { %953 = vst [vmem:[#allocation2 + $0x18] sm:$0xff] %v889_v3   ;;  %v495_v7 = vadd.f32 %v494_v5, %v406_v4  ;;  %v457_v8 = vpop.f32.mrf.mxu1  ;;  %v369_v12 = vadd.f32 %v1278_v49, %v368_v6 }
  0xe1   :  { %v540_v10 = vmax.f32 %v495_v7, 0.0  ;;  %v458_v16 = vadd.f32 %v457_v8, %v369_v12 }
  0xe3   :  { %v929_v11 = vpack.c.bf16 %v540_v10, %v539_v9  ;;  %v525_v21 = vmax.f32 %v458_v16, 0.0 }
  0xe4   :  { %v408_v13 = vpop.f32.mrf.mxu2 }
  0xe5   :  { %961 = vst [vmem:[#allocation2 + $0x58] sm:$0xff] %v929_v11   ;;  %v497_v14 = vpop.f32.mrf.mxu3  ;;  %v409_v19 = vadd.f32 %v1278_v49, %v408_v13 }
  0xe6   :  { %v370_v15 = vpop.f32.mrf.mxu0 }
  0xe7   :  { %v371_v17 = vadd.f32 %v1278_v49, %v370_v15  ;;  %v459_v18 = vpop.f32.mrf.mxu1  ;;  %v498_v24 = vadd.f32 %v497_v14, %v409_v19 }
  0xe9   :  { %v460_v20 = vadd.f32 %v459_v18, %v371_v17  ;;  %v541_v31 = vmax.f32 %v498_v24, 0.0 }
  0xeb   :  { %v526_v22 = vmax.f32 %v460_v20, 0.0 }
  0xec   :  { %v410_v23 = vpop.f32.mrf.mxu2 }
  0xed   :  { %v894_v25 = vpack.c.bf16 %v526_v22, %v525_v21  ;;  %v411_v26 = vadd.f32 %v1278_v49, %v410_v23  ;;  %v499_v27 = vpop.f32.mrf.mxu3 }
  0xee   :  { %v373_v28 = vpop.f32.mrf.mxu0 }
  0xef   :  { %954 = vst [vmem:[#allocation2 + $0x20] sm:$0xff] %v894_v25   ;;  %v500_v29 = vadd.f32 %v499_v27, %v411_v26  ;;  %v462_v30 = vpop.f32.mrf.mxu1  ;;  %v374_v34 = vadd.f32 %v1278_v49, %v373_v28 }
  0xf1   :  { %v542_v32 = vmax.f32 %v500_v29, 0.0  ;;  %v463_v38 = vadd.f32 %v462_v30, %v374_v34 }
  0xf3   :  { %v934_v33 = vpack.c.bf16 %v542_v32, %v541_v31  ;;  %v527_v43 = vmax.f32 %v463_v38, 0.0 }
  0xf4   :  { %v413_v35 = vpop.f32.mrf.mxu2 }
  0xf5   :  { %962 = vst [vmem:[#allocation2 + $0x60] sm:$0xff] %v934_v33   ;;  %v502_v36 = vpop.f32.mrf.mxu3  ;;  %v414_v41 = vadd.f32 %v1278_v49, %v413_v35 }
  0xf6   :  { %v375_v37 = vpop.f32.mrf.mxu0 }
  0xf7   :  { %v376_v39 = vadd.f32 %v1278_v49, %v375_v37  ;;  %v464_v40 = vpop.f32.mrf.mxu1  ;;  %v503_v46 = vadd.f32 %v502_v36, %v414_v41 }
  0xf9   :  { %v465_v42 = vadd.f32 %v464_v40, %v376_v39  ;;  %v543_v54 = vmax.f32 %v503_v46, 0.0 }
  0xfb   :  { %v528_v44 = vmax.f32 %v465_v42, 0.0 }
  0xfc   :  { %v415_v45 = vpop.f32.mrf.mxu2 }
  0xfd   :  { %v899_v47 = vpack.c.bf16 %v528_v44, %v527_v43  ;;  %v416_v48 = vadd.f32 %v1278_v49, %v415_v45  ;;  %v504_v50 = vpop.f32.mrf.mxu3 }
  0xfe   :  { %v378_v51 = vpop.f32.mrf.mxu0 }
  0xff   :  { %955 = vst [vmem:[#allocation2 + $0x28] sm:$0xff] %v899_v47   ;;  %v505_v52 = vadd.f32 %v504_v50, %v416_v48  ;;  %v467_v53 = vpop.f32.mrf.mxu1  ;;  %v379_v57 = vadd.f32 %v1278_v49, %v378_v51 }
 0x101   :  { %v544_v55 = vmax.f32 %v505_v52, 0.0  ;;  %v468_v61 = vadd.f32 %v467_v53, %v379_v57 }
 0x103   :  { %v939_v56 = vpack.c.bf16 %v544_v55, %v543_v54  ;;  %v529_v2 = vmax.f32 %v468_v61, 0.0 }
 0x104   :  { %v418_v58 = vpop.f32.mrf.mxu2 }
 0x105   :  { %963 = vst [vmem:[#allocation2 + $0x68] sm:$0xff] %v939_v56   ;;  %v507_v59 = vpop.f32.mrf.mxu3  ;;  %v419_v0 = vadd.f32 %v1278_v49, %v418_v58 }
 0x106   :  { %v380_v60 = vpop.f32.mrf.mxu0 }
 0x107   :  { %v381_v62 = vadd.f32 %v1278_v49, %v380_v60  ;;  %v469_v63 = vpop.f32.mrf.mxu1  ;;  %v508_v5 = vadd.f32 %v507_v59, %v419_v0 }
 0x109   :  { %v470_v1 = vadd.f32 %v469_v63, %v381_v62  ;;  %v545_v12 = vmax.f32 %v508_v5, 0.0 }
 0x10b   :  { %v530_v3 = vmax.f32 %v470_v1, 0.0 }
 0x10c   :  { %v420_v4 = vpop.f32.mrf.mxu2 }
 0x10d   :  { %v904_v6 = vpack.c.bf16 %v530_v3, %v529_v2  ;;  %v421_v7 = vadd.f32 %v1278_v49, %v420_v4  ;;  %v509_v8 = vpop.f32.mrf.mxu3 }
 0x10e   :  { %v383_v9 = vpop.f32.mrf.mxu0 }
 0x10f   :  { %956 = vst [vmem:[#allocation2 + $0x30] sm:$0xff] %v904_v6   ;;  %v510_v10 = vadd.f32 %v509_v8, %v421_v7  ;;  %v472_v11 = vpop.f32.mrf.mxu1  ;;  %v384_v15 = vadd.f32 %v1278_v49, %v383_v9 }
 0x111   :  { %v546_v13 = vmax.f32 %v510_v10, 0.0  ;;  %v473_v19 = vadd.f32 %v472_v11, %v384_v15 }
 0x113   :  { %v944_v14 = vpack.c.bf16 %v546_v13, %v545_v12  ;;  %v531_v24 = vmax.f32 %v473_v19, 0.0 }
 0x114   :  { %v423_v16 = vpop.f32.mrf.mxu2 }
 0x115   :  { %964 = vst [vmem:[#allocation2 + $0x70] sm:$0xff] %v944_v14   ;;  %v512_v17 = vpop.f32.mrf.mxu3  ;;  %v424_v22 = vadd.f32 %v1278_v49, %v423_v16 }
 0x116   :  { %v385_v18 = vpop.f32.mrf.mxu0 }
 0x117   :  { %v386_v20 = vadd.f32 %v1278_v49, %v385_v18  ;;  %v474_v21 = vpop.f32.mrf.mxu1  ;;  %v513_v27 = vadd.f32 %v512_v17, %v424_v22 }
 0x119   :  { %v475_v23 = vadd.f32 %v474_v21, %v386_v20  ;;  %v547_v32 = vmax.f32 %v513_v27, 0.0 }
 0x11b   :  { %v532_v25 = vmax.f32 %v475_v23, 0.0 }
 0x11c   :  { %v425_v26 = vpop.f32.mrf.mxu2 }
 0x11d   :  { %v909_v28 = vpack.c.bf16 %v532_v25, %v531_v24  ;;  %v426_v29 = vadd.f32 %v1278_v49, %v425_v26  ;;  %v514_v30 = vpop.f32.mrf.mxu3 }
 0x11f   :  { %957 = vst [vmem:[#allocation2 + $0x38] sm:$0xff] %v909_v28   ;;  %v515_v31 = vadd.f32 %v514_v30, %v426_v29 }
 0x121   :  { %v548_v33 = vmax.f32 %v515_v31, 0.0 }
 0x123   :  { %v949_v34 = vpack.c.bf16 %v548_v33, %v547_v32 }
 0x125   :  { %965 = vst [vmem:[#allocation2 + $0x78] sm:$0xff] %v949_v34  }
 0x126   :  { %625 = dma.vmem_to_hbm [thread:$0]  %s618_s2, 2048, %s620_s9, [#allocation3], %s1013_s10, %s1013_s10, %s1014_s11  }
 0x127   :  { %1010 = dma.done.wait [#allocation3], 2048  }
 0x128   :  { %1011 = vsyncadd [#allocation3], 4294965248 }
 0x129   :  { %630 = vsyncpa [#allocation3], 1 }

</bundles_post_ra>
